<compile_context>
chip_gen: v7x
topology: tpu7x:2x2x1
jax: 0.10.0
libtpu: 0.0.40
codegen_flags: <defaults>
</compile_context>

<pallas_src>
import jax
import jax.numpy as jnp
from jax.experimental import pallas as pl
from jax.experimental.pallas import tpu as pltpu


# ----------------------------------------------------------------------------
# Small helpers
# ----------------------------------------------------------------------------
def _cdiv(a, b):
    return -(-a // b)


def _round_up(a, m):
    return _cdiv(a, m) * m


def _tpu_caps():
    """Best-effort (vmem_capacity_bytes, tensorcores_per_chip) query."""
    vmem = 128 << 20          # v5e / v6e physical VMEM per TensorCore
    n_tc = 1
    kind = ""
    try:
        kind = jax.devices()[0].device_kind.lower()
    except Exception:
        pass
    try:
        info = pltpu.get_tpu_info()
        vmem = int(getattr(info, "vmem_capacity_bytes", vmem))
    except Exception:
        pass
    if ("v7" in kind) or ("7x" in kind):
        n_tc = 2                       # v7x: 2 TensorCores per chip
        vmem = min(vmem, 64 << 20)     # 64 MiB VMEM per TensorCore
    return vmem, n_tc


def _pick_tile_rows(rows, hidden, itemsize, vmem_bytes, n_tc):
    """Row-tile sized on HBM bytes moved per step, guarded by VMEM footprint."""
    # Sub-32-bit dtypes pack along sublanes -> keep row tiles multiples of 16.
    align = 16 if itemsize < 4 else 8
    rows_up = _round_up(max(rows, 1), align)
    hidden = max(hidden, 1)

    # Target NATIVE input-block bytes per grid step (so bf16 gets ~2x the rows
    # of f32).  v7x (3.2 TB/s HBM): ~6 MiB in -> ~12 MiB in+out moved per step;
    # v5e/v6e: ~4 MiB in -> ~8 MiB moved.  Keeps the ~0.35 us step overhead
    # well under 10% of the per-step DMA time.
    target_in_bytes = (6 << 20) if n_tc >= 2 else (4 << 20)
    row_in_bytes = hidden * itemsize
    tile = max(align, (target_in_bytes // row_in_bytes) // align * align)

    # VMEM footprint guard: double-buffered in+out blocks in native dtype plus
    # ~2 f32-sized temporaries (the f32 upcast and the centered copy).
    bytes_per_row = 2 * 2 * hidden * itemsize + 2 * hidden * 4
    vmem_cap = int(vmem_bytes * 0.6)
    max_rows_vmem = max(align, (vmem_cap // bytes_per_row) // align * align)
    # TODO(synk): extremely wide hidden (where even `align` rows exceed the
    # VMEM cap) would need a second-level tiling of the hidden axis; not
    # implemented since the expected shapes are narrow.
    tile = min(tile, max_rows_vmem, rows_up)

    # Multi-TensorCore (v7x only) grid shaping: split work across the two TCs,
    # but only when each step still moves a worthwhile chunk (>= 2 MiB in+out),
    # and prefer an even step count so neither core idles on the tail block.
    if n_tc >= 2 and rows_up > align:
        min_step_bytes = 2 << 20

        def moved(t):
            return 2 * t * row_in_bytes

        steps = _cdiv(rows_up, tile)
        if steps == 1:
            half = max(align, _round_up(_cdiv(rows_up, 2), align))
            if half < tile and moved(half) >= min_step_bytes:
                tile = half
        elif steps % 2 == 1:
            even = max(align, _round_up(_cdiv(rows_up, steps + 1), align))
            if (even < tile and moved(even) >= min_step_bytes
                    and _cdiv(rows_up, even) % 2 == 0):
                tile = even
    return tile


def _vmem_limit_bytes(tile_rows, hidden, itemsize, vmem_bytes):
    """Scoped-VMEM limit from the actual footprint, capped per generation."""
    footprint = tile_rows * (2 * 2 * hidden * itemsize + 2 * hidden * 4)
    limit = footprint + (12 << 20)            # margin for Mosaic internal scratch
    limit = min(limit, vmem_bytes - (8 << 20))
    limit = max(limit, 32 << 20)
    return int(limit)


# ----------------------------------------------------------------------------
# Kernel
# ----------------------------------------------------------------------------
def _make_norm_kernel(hidden, reduce_via_mxu):
    inv_n = 1.0 / hidden
    # hidden == 1: torch.std (ddof=1) is NaN; 0 * inf reproduces that.
    inv_nm1 = (1.0 / (hidden - 1)) if hidden > 1 else float("inf")

    def kernel(x_ref, o_ref):
        x = x_ref[...].astype(jnp.float32)             # (tile_rows, hidden)

        if reduce_via_mxu:
            # Review item (conditional): if the XLU lane-reduce binds at small
            # hidden, run the row sums on the otherwise-idle MXU instead.
            # HIGHEST precision keeps the f32 decomposition ~f32-accurate.
            ones = jnp.ones((hidden, 1), dtype=jnp.float32)

            def rowsum(v):
                return jnp.dot(v, ones,
                               precision=jax.lax.Precision.HIGHEST,
                               preferred_element_type=jnp.float32)
        else:
            def rowsum(v):
                return jnp.sum(v, axis=-1, keepdims=True)

        # Two-pass (centered) variance: mean first, then sum((x-mean)^2).
        # Numerically robust for large-mean data; the extra pass is hidden
        # under the HBM DMA since the tile is already resident in VMEM.
        mean = rowsum(x) * inv_n
        d = x - mean
        std = jnp.sqrt(rowsum(d * d) * inv_nm1)

        # Exact per-row reciprocal (only tile_rows divides; approx=True's
        # ~2^-12 relative error would not clear a 1e-5 validation tolerance).
        inv = 1.0 / (std + 1e-5)
        o_ref[...] = (d * inv).astype(o_ref.dtype)

    return kernel


# ----------------------------------------------------------------------------
# Wrapper
# ----------------------------------------------------------------------------
def custom_normalization(logits, *, tile_rows=None, reduce_via_mxu=False):
    """Normalize over the last dimension, matching the PyTorch module."""
    orig_shape = logits.shape
    hidden = orig_shape[-1]
    x2d = logits.reshape(-1, hidden)
    rows = x2d.shape[0]
    itemsize = jnp.dtype(logits.dtype).itemsize

    vmem_bytes, n_tc = _tpu_caps()
    if tile_rows is None:
        tile_rows = _pick_tile_rows(rows, hidden, itemsize, vmem_bytes, n_tc)

    out2d = pl.pallas_call(
        _make_norm_kernel(hidden, reduce_via_mxu),
        out_shape=jax.ShapeDtypeStruct((rows, hidden), logits.dtype),
        grid_spec=pltpu.PrefetchScalarGridSpec(
            num_scalar_prefetch=0,
            grid=(_cdiv(rows, tile_rows),),            # partial last block masked
            in_specs=[pl.BlockSpec((tile_rows, hidden), lambda i: (i, 0))],
            # hidden % 128 == 0 -> lane-dense unmasked stores (expected case);
            # other widths fall back to masked vst.msk partial stores.
            out_specs=pl.BlockSpec((tile_rows, hidden), lambda i: (i, 0)),
        ),
        compiler_params=pltpu.CompilerParams(
            dimension_semantics=("parallel",),
            vmem_limit_bytes=_vmem_limit_bytes(tile_rows, hidden, itemsize,
                                               vmem_bytes),
        ),
    )(x2d)

    return out2d.reshape(orig_shape)


# ----------------------------------------------------------------------------
# Reference + smoke test
# ----------------------------------------------------------------------------
def _reference(logits):
    x = logits.astype(jnp.float32)
    mean = jnp.mean(x, axis=-1, keepdims=True)
    std = jnp.std(x, axis=-1, keepdims=True, ddof=1)   # unbiased, like torch.std
    return ((x - mean) / (std + 1e-5)).astype(logits.dtype)


if __name__ == "__main__":
    key = jax.random.PRNGKey(0)
    k1, k2, k3 = jax.random.split(key, 3)

    # Small shape consistent with the module: (batch=2, seq=8, hidden=128).
    x = jax.random.normal(k1, (2, 8, 128), dtype=jnp.float32)
    out = jax.block_until_ready(custom_normalization(x))
    ref = _reference(x)
    assert out.shape == x.shape and out.dtype == x.dtype
    assert jnp.allclose(out, ref, atol=1e-5, rtol=1e-5)

    # Ragged row count exercises the masked partial block (no pad copy).
    y = jax.random.normal(k2, (3, 5, 128), dtype=jnp.float32)
    out2 = jax.block_until_ready(custom_normalization(y))
    ref2 = _reference(y)
    assert out2.shape == y.shape and out2.dtype == y.dtype
    assert jnp.allclose(out2, ref2, atol=1e-5, rtol=1e-5)

    # bf16 exercises the native-byte tile budget + 16-row sublane alignment.
    z = jax.random.normal(k3, (2, 24, 128), dtype=jnp.bfloat16)
    out3 = jax.block_until_ready(custom_normalization(z))
    ref3 = _reference(z)
    assert out3.shape == z.shape and out3.dtype == z.dtype
    assert jnp.allclose(out3.astype(jnp.float32), ref3.astype(jnp.float32),
                        atol=5e-2, rtol=5e-2)

    print("KERNEL_OK")
</pallas_src>

<mosaic_0001>
module attributes {stable_mosaic.version = 11 : i64} {
  func.func @kernel(%arg0: i32, %arg1: memref<16x128xf32, #tpu.memory_space<vmem>>, %arg2: memref<16x128xf32, #tpu.memory_space<vmem>>) attributes {dimension_semantics = [#tpu.dimension_semantics<parallel>], iteration_bounds = array<i64: 1>, scalar_prefetch = 0 : i64, scratch_operands = 0 : i64, tpu.core_type = #tpu.core_type<tc>, window_params = [{transform_indices = @transform_0, window_bounds = array<i64: 16, 128>}, {transform_indices = @transform_1, window_bounds = array<i64: 16, 128>}]} {
    %c0 = arith.constant 0 : index
    %c0_0 = arith.constant 0 : index
    %0 = vector.load %arg1[%c0, %c0_0] : memref<16x128xf32, #tpu.memory_space<vmem>>, vector<16x128xf32>
    %cst = arith.constant dense<0.000000e+00> : vector<16xf32>
    %1 = vector.multi_reduction <add>, %0, %cst [1] : vector<16x128xf32> to vector<16xf32>
    %2 = vector.shape_cast %1 : vector<16xf32> to vector<16x1xf32>
    %cst_1 = arith.constant 7.812500e-03 : f32
    %3 = vector.broadcast %cst_1 : f32 to vector<16x1xf32>
    %4 = arith.mulf %2, %3 : vector<16x1xf32>
    %5 = vector.broadcast %4 : vector<16x1xf32> to vector<16x128xf32>
    %6 = arith.subf %0, %5 : vector<16x128xf32>
    %7 = arith.mulf %6, %6 : vector<16x128xf32>
    %cst_2 = arith.constant dense<0.000000e+00> : vector<16xf32>
    %8 = vector.multi_reduction <add>, %7, %cst_2 [1] : vector<16x128xf32> to vector<16xf32>
    %9 = vector.shape_cast %8 : vector<16xf32> to vector<16x1xf32>
    %cst_3 = arith.constant 0.00787401571 : f32
    %10 = vector.broadcast %cst_3 : f32 to vector<16x1xf32>
    %11 = arith.mulf %9, %10 : vector<16x1xf32>
    %12 = math.sqrt %11 : vector<16x1xf32>
    %cst_4 = arith.constant 9.99999974E-6 : f32
    %13 = vector.broadcast %cst_4 : f32 to vector<16x1xf32>
    %14 = arith.addf %12, %13 : vector<16x1xf32>
    %cst_5 = arith.constant 1.000000e+00 : f32
    %15 = vector.broadcast %cst_5 : f32 to vector<16x1xf32>
    %16 = arith.divf %15, %14 : vector<16x1xf32>
    %17 = vector.broadcast %16 : vector<16x1xf32> to vector<16x128xf32>
    %18 = arith.mulf %6, %17 : vector<16x128xf32>
    %c0_6 = arith.constant 0 : index
    %c0_7 = arith.constant 0 : index
    %19 = vector.load %arg2[%c0_6, %c0_7] : memref<16x128xf32, #tpu.memory_space<vmem>>, vector<16x128xf32>
    tpu.vector_store %arg2[%c0_6, %c0_7], %18 {strides = array<i32>} : memref<16x128xf32, #tpu.memory_space<vmem>>, vector<16x128xf32>,
    return
  }
  func.func @transform_0(%arg0: i32) -> (i32, i32) {
    %c0_i32 = arith.constant 0 : i32
    %c0_i32_0 = arith.constant 0 : i32
    return %arg0, %c0_i32 : i32, i32
  }
  func.func @transform_1(%arg0: i32) -> (i32, i32) {
    %c0_i32 = arith.constant 0 : i32
    %c0_i32_0 = arith.constant 0 : i32
    return %arg0, %c0_i32 : i32, i32
  }
}

</mosaic_0001>

<bundles_post_ra>
// kernel: tpu_custom_call.1
= control target key start
LH: loop header
LB: loop body
LE: loop exit
PB: predicated region body
PF: predicated region fallthrough
CT: control target
= control target key end

     0   :  { %6 = vsyncpa [#allocation3], 0  ;;  %s186_s0 = inlined_call_operand.hbm [shape: f32[16,128], index: 0, kind: input, shape index: {}]   ;;  %s187_s1 = inlined_call_operand.hbm [shape: f32[16,128], index: 1, kind: output, shape index: {}]  }
   0x1   :  { %7 = vsyncpa [#allocation4], 0  ;;  %s142_s6 = smov [#allocation2]   ;;  %s94_s10 = scalar_lea.hbm %s186_s0, 256 }
   0x2   :  { %s13_s7 = sshll.u32 %s142_s6, 4  ;;  %p95_p0 = scmp.ne.s32.totalorder %s186_s0, %s94_s10  ;;  %s14_s7 = int_to_ptr.vmem [resolvable:$true] %s13_s7 }
   0x3   :  { %p98_p1 = scmp.lt.u32.totalorder %s94_s10, %s186_s0 }
   0x5   :  { %p100_p2 = pnand %p98_p1, %p95_p0 }
   0x7   :  { %103 = shalt.err (!%p100_p2)
}
   0x8   :  { %s104_s15 = scalar_lea.vmem %s14_s7, 256  ;;  %p109_p4 = scmp.lt.s32.totalorder %s14_s7, %s14_s7 }
   0x9   :  { %p105_p3 = scmp.ne.s32.totalorder %s14_s7, %s104_s15  ;;  %p110_p5 = scmp.lt.s32.totalorder %s104_s15, %s104_s15 }
   0xb   :  { %p111_p6 = por %p110_p5, %p109_p4 }
   0xd   :  { %p112_p7 = pnand %p111_p6, %p105_p3 }
   0xf   :  { %115 = shalt.err (!%p112_p7)
}
  0x10   :  { %s143_s16 = smov 128   ;;  %s144_s17 = smov 8  }
  0x11   :  { %19 = dma.hbm_to_vmem [thread:$0]  %s186_s0, 256, %s14_s7, [#allocation3], %s143_s16, %s143_s16, %s144_s17  }
  0x12   :  { %138 = dma.done.wait [#allocation3], 256  }
  0x13   :  { %139 = vsyncadd [#allocation3], 4294967040  ;;  %v23_v0 = vld [vmem:[#allocation2] sm:$0xff]  ;;  %v24_v1 = vld [vmem:[#allocation2 + $0x8] sm:$0xff]  ;;  %s145_s0 = smov [#allocation5]  }
  0x14   :  { %25 = vadd.xlane.f32.xlu0 %v23_v0  ;;  %s70_s20 = sshll.u32 %s145_s0, 4  ;;  %s71_s20 = int_to_ptr.vmem [resolvable:$true] %s70_s20 }
  0x15   :  { %s116_s21 = scalar_lea.vmem %s71_s20, 256  ;;  %p121_p9 = scmp.lt.s32.totalorder %s71_s20, %s71_s20 }
  0x16   :  { %p117_p8 = scmp.ne.s32.totalorder %s71_s20, %s116_s21  ;;  %p122_p10 = scmp.lt.s32.totalorder %s116_s21, %s116_s21 }
  0x18   :  { %27 = vadd.xlane.f32.xlu0 %v24_v1  ;;  %p123_p11 = por %p122_p10, %p121_p9 }
  0x1a   :  { %p124_p12 = pnand %p123_p11, %p117_p8 }
  0xa1   :  { %v26_v2 = vpop.xlane.xlu0 %25 }
  0xa2   :  { %v29_v3 = vmul.f32 0.0078125, %v26_v2 }
  0xa4   :  { %v31_v4 = vsub.f32 %v23_v0, %v29_v3 }
  0xa5   :  { %v28_v5 = vpop.xlane.xlu0 %27 }
  0xa6   :  { %v30_v6 = vmul.f32 0.0078125, %v28_v5  ;;  %v33_v7 = vmul.f32 %v31_v4, %v31_v4 }
  0xa8   :  { %v32_v8 = vsub.f32 %v24_v1, %v30_v6  ;;  %35 = vadd.xlane.f32.xlu1 %v33_v7 }
  0xaa   :  { %v34_v9 = vmul.f32 %v32_v8, %v32_v8 }
  0xac   :  { %37 = vadd.xlane.f32.xlu1 %v34_v9 }
 0x135   :  { %v36_v10 = vpop.xlane.xlu1 %35 }
 0x136   :  { %v39_v11 = vmul.f32 0.007874016, %v36_v10 }
 0x138   :  { %86 = vrsqrt.f32 %v39_v11  ;;  %vm43_vm0 = vcmp.eq.f32.partialorder %v39_v11, inf  ;;  %v46_v16 = vand.u32 2147483648, %v39_v11  ;;  %vm45_vm1 = vcmp.eq.f32.partialorder %v39_v11, 0.0 }
 0x139   :  { %v38_v12 = vpop.xlane.xlu1 %37 }
 0x13a   :  { %v40_v13 = vmul.f32 0.007874016, %v38_v12 }
 0x13c   :  { %88 = vrsqrt.f32 %v40_v13  ;;  %vm50_vm2 = vcmp.eq.f32.partialorder %v40_v13, inf  ;;  %v53_v22 = vand.u32 2147483648, %v40_v13  ;;  %vm52_vm3 = vcmp.eq.f32.partialorder %v40_v13, 0.0 }
 0x142   :  { %v87_v14 = vpop.eup %86 }
 0x143   :  { %v42_v15 = vmul.f32 %v87_v14, %v39_v11 }
 0x145   :  { %v44_v17 = vsel %vm43_vm0, %v39_v11, %v42_v15 }
 0x146   :  { %v89_v18 = vpop.eup %88  ;;  %v47_v19 = vsel %vm45_vm1, %v46_v16, %v44_v17 }
 0x147   :  { %v49_v20 = vmul.f32 %v89_v18, %v40_v13  ;;  %v55_v21 = vadd.f32 1e-05, %v47_v19 }
 0x149   :  { %v51_v23 = vsel %vm50_vm2, %v40_v13, %v49_v20  ;;  %90 = vrcp.f32 %v55_v21 }
 0x14a   :  { %v54_v24 = vsel %vm52_vm3, %v53_v22, %v51_v23 }
 0x14b   :  { %v56_v25 = vadd.f32 1e-05, %v54_v24 }
 0x14d   :  { %92 = vrcp.f32 %v56_v25 }
 0x153   :  { %v91_v26 = vpop.eup %90 }
 0x154   :  { %v61_v27 = vmul.f32 %v91_v26, %v31_v4 }
 0x156   :  { %63 = vst [vmem:[#allocation5] sm:$0xff] %v61_v27 }
 0x157   :  { %v93_v28 = vpop.eup %92 }
 0x158   :  { %v62_v29 = vmul.f32 %v93_v28, %v32_v8 }
 0x15a   :  { %64 = vst [vmem:[#allocation5 + $0x8] sm:$0xff] %v62_v29 }
 0x15b   :  { %127 = shalt.err (!%p124_p12)
}
 0x15c   :  { %s128_s24 = scalar_lea.hbm %s187_s1, 256 }
 0x15d   :  { %p129_p13 = scmp.ne.s32.totalorder %s187_s1, %s128_s24  ;;  %p132_p0 = scmp.lt.u32.totalorder %s128_s24, %s187_s1 }
 0x15f   :  { %p134_p1 = pnand %p132_p0, %p129_p13 }
 0x161   :  { %137 = shalt.err (!%p134_p1)
}
 0x162   :  { %76 = dma.vmem_to_hbm [thread:$0]  %s71_s20, 256, %s187_s1, [#allocation4], %s143_s16, %s143_s16, %s144_s17  }
 0x163   :  { %140 = dma.done.wait [#allocation4], 256  }
 0x164   :  { %141 = vsyncadd [#allocation4], 4294967040 }
 0x165   :  { %80 = vsyncpa [#allocation3], 1 }
 0x166   :  { %81 = vsyncpa [#allocation4], 1 }

</bundles_post_ra>
